<compile_context>
chip_gen: v7x
topology: tpu7x:2x2x1
jax: 0.10.0
libtpu: 0.0.40
codegen_flags: <defaults>
</compile_context>

<pallas_src>
import jax
import jax.numpy as jnp
from jax.experimental import pallas as pl
from jax.experimental.pallas import tpu as pltpu


# ----------------------------------------------------------------------------
# Fused SE-block kernel: one batch element per grid step.
# ----------------------------------------------------------------------------
def se_block_kernel(x_ref, w1_ref, b1_ref, w2_ref, b2_ref, o_ref):
    # x_ref : (1, C, HW)   channels on sublanes, H*W on the 128-lane axis
    # w1_ref: (Cr, C)      fc1 weight, PyTorch [out, in] layout
    # b1_ref: (Cr, 1)      fc1 bias (column)
    # w2_ref: (C, Cr)      fc2 weight, PyTorch [out, in] layout
    # b2_ref: (C, 1)       fc2 bias (column)
    # o_ref : (1, C, HW)
    x = x_ref[0]                                          # (C, HW), stays in VMEM
    hw = x.shape[1]

    # Squeeze: global average pool over the spatial (lane) axis -> (C, 1).
    pooled = jnp.sum(x, axis=1, keepdims=True) * (1.0 / hw)

    # Excite: fc1 -> ReLU -> fc2 -> sigmoid, tiny column matmuls, all in VMEM.
    h = jnp.dot(w1_ref[...], pooled, preferred_element_type=jnp.float32)
    h = jnp.maximum(h + b1_ref[...], 0.0)                 # (Cr, 1)
    g = jnp.dot(w2_ref[...], h, preferred_element_type=jnp.float32)
    g = g + b2_ref[...]                                   # (C, 1)
    gate = 1.0 / (1.0 + jnp.exp(-g))                      # exact sigmoid (EUP exp)

    # Scale: broadcast the per-channel gate across the lane axis.
    # Lane-dense store: minor dim HW = 256 -> unmasked vst.
    o_ref[0] = (x * gate).astype(o_ref.dtype)


def se_block(x_nchw, w1, b1, w2, b2):
    """SEBlock forward. x_nchw: (N, C, H, W); weights in PyTorch [out, in] layout."""
    N, C, H, W = x_nchw.shape
    HW = H * W
    Cr = w1.shape[0]

    # Free reshape: NCHW is already (channels, spatial-contiguous); no transpose.
    x2 = x_nchw.reshape(N, C, HW)

    out = pl.pallas_call(
        se_block_kernel,
        out_shape=jax.ShapeDtypeStruct((N, C, HW), jnp.float32),
        grid=(N,),
        in_specs=[
            pl.BlockSpec((1, C, HW), lambda n: (n, 0, 0)),
            pl.BlockSpec((Cr, C), lambda n: (0, 0)),
            pl.BlockSpec((Cr, 1), lambda n: (0, 0)),
            pl.BlockSpec((C, Cr), lambda n: (0, 0)),
            pl.BlockSpec((C, 1), lambda n: (0, 0)),
        ],
        out_specs=pl.BlockSpec((1, C, HW), lambda n: (n, 0, 0)),
        compiler_params=pltpu.CompilerParams(
            dimension_semantics=("parallel",),   # shards batch across TCs on v7x
        ),
    )(x2, w1, b1.reshape(Cr, 1), w2, b2.reshape(C, 1))

    return out.reshape(N, C, H, W)


# ----------------------------------------------------------------------------
# Pure-JAX reference (mirrors the PyTorch forward exactly).
# ----------------------------------------------------------------------------
def _ref_se_block(x, w1, b1, w2, b2):
    N, C, H, W = x.shape
    y = jnp.mean(x, axis=(2, 3))                          # AdaptiveAvgPool2d(1).view(b, c)
    y = jnp.maximum(y @ w1.T + b1, 0.0)                   # F.relu(fc1(y))
    y = 1.0 / (1.0 + jnp.exp(-(y @ w2.T + b2)))           # torch.sigmoid(fc2(y))
    return x * y[:, :, None, None]


if __name__ == "__main__":
    # Small shapes consistent with the module (reduction=8 needs C >= 8).
    N, C, H, W = 2, 32, 16, 16
    reduction = 8
    Cr = C // reduction

    key = jax.random.PRNGKey(0)
    k1, k2, k3, k4, k5 = jax.random.split(key, 5)
    x = jax.random.normal(k1, (N, C, H, W), jnp.float32)
    # PyTorch nn.Linear weight layout: (out_features, in_features).
    w1 = 0.1 * jax.random.normal(k2, (Cr, C), jnp.float32)
    b1 = 0.1 * jax.random.normal(k3, (Cr,), jnp.float32)
    w2 = 0.1 * jax.random.normal(k4, (C, Cr), jnp.float32)
    b2 = 0.1 * jax.random.normal(k5, (C,), jnp.float32)

    out = jax.jit(se_block)(x, w1, b1, w2, b2)
    out = jax.block_until_ready(out)

    ref = _ref_se_block(x, w1, b1, w2, b2)
    assert out.shape == (N, C, H, W)
    assert jnp.allclose(out, ref, rtol=1e-4, atol=1e-5)

    print("KERNEL_OK")
</pallas_src>

<mosaic_0001>
module attributes {stable_mosaic.version = 11 : i64} {
  func.func @se_block_kernel(%arg0: i32, %arg1: memref<1x32x256xf32, #tpu.memory_space<vmem>>, %arg2: memref<4x32xf32, #tpu.memory_space<vmem>>, %arg3: memref<4x1xf32, #tpu.memory_space<vmem>>, %arg4: memref<32x4xf32, #tpu.memory_space<vmem>>, %arg5: memref<32x1xf32, #tpu.memory_space<vmem>>, %arg6: memref<1x32x256xf32, #tpu.memory_space<vmem>>) attributes {dimension_semantics = [#tpu.dimension_semantics<parallel>], iteration_bounds = array<i64: 2>, scalar_prefetch = 0 : i64, scratch_operands = 0 : i64, tpu.core_type = #tpu.core_type<tc>, window_params = [{transform_indices = @transform_0, window_bounds = array<i64: 1, 32, 256>}, {pipeline_mode = #tpu.pipeline_mode<synchronous>, transform_indices = @transform_1, window_bounds = array<i64: 4, 32>}, {pipeline_mode = #tpu.pipeline_mode<synchronous>, transform_indices = @transform_2, window_bounds = array<i64: 4, 1>}, {pipeline_mode = #tpu.pipeline_mode<synchronous>, transform_indices = @transform_3, window_bounds = array<i64: 32, 4>}, {pipeline_mode = #tpu.pipeline_mode<synchronous>, transform_indices = @transform_4, window_bounds = array<i64: 32, 1>}, {transform_indices = @transform_5, window_bounds = array<i64: 1, 32, 256>}]} {
    %c0 = arith.constant 0 : index
    %c0_0 = arith.constant 0 : index
    %c0_1 = arith.constant 0 : index
    %0 = vector.load %arg1[%c0, %c0_0, %c0_1] : memref<1x32x256xf32, #tpu.memory_space<vmem>>, vector<1x32x256xf32>
    %1 = vector.shape_cast %0 : vector<1x32x256xf32> to vector<32x256xf32>
    %cst = arith.constant dense<0.000000e+00> : vector<32xf32>
    %2 = vector.multi_reduction <add>, %1, %cst [1] : vector<32x256xf32> to vector<32xf32>
    %3 = vector.shape_cast %2 : vector<32xf32> to vector<32x1xf32>
    %cst_2 = arith.constant 3.906250e-03 : f32
    %4 = vector.broadcast %cst_2 : f32 to vector<32x1xf32>
    %5 = arith.mulf %3, %4 : vector<32x1xf32>
    %c0_3 = arith.constant 0 : index
    %c0_4 = arith.constant 0 : index
    %6 = vector.load %arg2[%c0_3, %c0_4] : memref<4x32xf32, #tpu.memory_space<vmem>>, vector<4x32xf32>
    %cst_5 = arith.constant dense<0.000000e+00> : vector<4x1xf32>
    %7 = tpu.matmul %6, %5, %cst_5 {dimension_numbers = #tpu.dot_dimension_numbers<[1], [0], [0], [1], [0, 0, 1, 1], [], []>} : vector<4x32xf32>, vector<32x1xf32>, vector<4x1xf32> -> vector<4x1xf32>
    %c0_6 = arith.constant 0 : index
    %c0_7 = arith.constant 0 : index
    %8 = vector.load %arg3[%c0_6, %c0_7] : memref<4x1xf32, #tpu.memory_space<vmem>>, vector<4x1xf32>
    %9 = arith.addf %7, %8 : vector<4x1xf32>
    %cst_8 = arith.constant 0.000000e+00 : f32
    %10 = vector.broadcast %cst_8 : f32 to vector<4x1xf32>
    %11 = arith.maximumf %9, %10 : vector<4x1xf32>
    %c0_9 = arith.constant 0 : index
    %c0_10 = arith.constant 0 : index
    %12 = vector.load %arg4[%c0_9, %c0_10] : memref<32x4xf32, #tpu.memory_space<vmem>>, vector<32x4xf32>
    %cst_11 = arith.constant dense<0.000000e+00> : vector<32x1xf32>
    %13 = tpu.matmul %12, %11, %cst_11 {dimension_numbers = #tpu.dot_dimension_numbers<[1], [0], [0], [1], [0, 0, 1, 1], [], []>} : vector<32x4xf32>, vector<4x1xf32>, vector<32x1xf32> -> vector<32x1xf32>
    %c0_12 = arith.constant 0 : index
    %c0_13 = arith.constant 0 : index
    %14 = vector.load %arg5[%c0_12, %c0_13] : memref<32x1xf32, #tpu.memory_space<vmem>>, vector<32x1xf32>
    %15 = arith.addf %13, %14 : vector<32x1xf32>
    %cst_14 = arith.constant 0.000000e+00 : f32
    %16 = vector.broadcast %cst_14 : f32 to vector<32x1xf32>
    %17 = arith.subf %16, %15 : vector<32x1xf32>
    %18 = math.exp %17 : vector<32x1xf32>
    %cst_15 = arith.constant 1.000000e+00 : f32
    %19 = vector.broadcast %cst_15 : f32 to vector<32x1xf32>
    %20 = arith.addf %19, %18 : vector<32x1xf32>
    %cst_16 = arith.constant 1.000000e+00 : f32
    %21 = vector.broadcast %cst_16 : f32 to vector<32x1xf32>
    %22 = arith.divf %21, %20 : vector<32x1xf32>
    %23 = vector.broadcast %22 : vector<32x1xf32> to vector<32x256xf32>
    %24 = arith.mulf %1, %23 : vector<32x256xf32>
    %c0_17 = arith.constant 0 : index
    %c0_18 = arith.constant 0 : index
    %c0_19 = arith.constant 0 : index
    %25 = vector.load %arg6[%c0_17, %c0_18, %c0_19] : memref<1x32x256xf32, #tpu.memory_space<vmem>>, vector<1x32x256xf32>
    %26 = vector.shape_cast %25 : vector<1x32x256xf32> to vector<32x256xf32>
    %27 = vector.shape_cast %24 : vector<32x256xf32> to vector<1x32x256xf32>
    tpu.vector_store %arg6[%c0_17, %c0_18, %c0_19], %27 {strides = array<i32>} : memref<1x32x256xf32, #tpu.memory_space<vmem>>, vector<1x32x256xf32>,
    return
  }
  func.func @transform_0(%arg0: i32) -> (i32, i32, i32) {
    %c0_i32 = arith.constant 0 : i32
    %c0_i32_0 = arith.constant 0 : i32
    %c0_i32_1 = arith.constant 0 : i32
    return %arg0, %c0_i32, %c0_i32_0 : i32, i32, i32
  }
  func.func @transform_1(%arg0: i32) -> (i32, i32) {
    %c0_i32 = arith.constant 0 : i32
    %c0_i32_0 = arith.constant 0 : i32
    %c0_i32_1 = arith.constant 0 : i32
    return %c0_i32, %c0_i32_0 : i32, i32
  }
  func.func @transform_2(%arg0: i32) -> (i32, i32) {
    %c0_i32 = arith.constant 0 : i32
    %c0_i32_0 = arith.constant 0 : i32
    %c0_i32_1 = arith.constant 0 : i32
    return %c0_i32, %c0_i32_0 : i32, i32
  }
  func.func @transform_3(%arg0: i32) -> (i32, i32) {
    %c0_i32 = arith.constant 0 : i32
    %c0_i32_0 = arith.constant 0 : i32
    %c0_i32_1 = arith.constant 0 : i32
    return %c0_i32, %c0_i32_0 : i32, i32
  }
  func.func @transform_4(%arg0: i32) -> (i32, i32) {
    %c0_i32 = arith.constant 0 : i32
    %c0_i32_0 = arith.constant 0 : i32
    %c0_i32_1 = arith.constant 0 : i32
    return %c0_i32, %c0_i32_0 : i32, i32
  }
  func.func @transform_5(%arg0: i32) -> (i32, i32, i32) {
    %c0_i32 = arith.constant 0 : i32
    %c0_i32_0 = arith.constant 0 : i32
    %c0_i32_1 = arith.constant 0 : i32
    return %arg0, %c0_i32, %c0_i32_0 : i32, i32, i32
  }
}

</mosaic_0001>

<bundles_post_ra>
// kernel: se_block.1
= control target key start
LH: loop header
LB: loop body
LE: loop exit
PB: predicated region body
PF: predicated region fallthrough
CT: control target
= control target key end

     0   :  { %s677_s18 = smov 0   ;;  %s763_s0 = inlined_call_operand.vmem [shape: f32[2,32,256], index: 0, kind: input, shape index: {}]   ;;  %s764_s1 = inlined_call_operand.vmem [shape: f32[4,32], index: 1, kind: input, shape index: {}]   ;;  %s765_s2 = inlined_call_operand.vmem [shape: f32[4,1], index: 2, kind: input, shape index: {}]   ;;  %s766_s3 = inlined_call_operand.vmem [shape: f32[32,4], index: 3, kind: input, shape index: {}]   ;;  %s767_s4 = inlined_call_operand.vmem [shape: f32[32,1], index: 4, kind: input, shape index: {}]   ;;  %s768_s5 = inlined_call_operand.vmem [shape: f32[2,32,256], index: 5, kind: output, shape index: {}]  }
   0x1 LB: > { %s551_s19 = sadd.s32 4294967295, %s641_s18   ;;  %p555_p0 = scmp.ge.s32.totalorder %s641_s18, 1  ;;  %s641_s18 = sphi %s677_s18, %s15_s18  }
   0x2   : > { %p187_p1 = scmp.lt.s32.totalorder %s641_s18, 3 }
   0x4   : > { %p188_p2 = pnand %p555_p0, %p187_p1 }
   0x5   : > { %p215_p3 = scmp.lt.s32.totalorder (!%p188_p2), %s551_s19, 1  ;;  %v643_v12 = vmov (!%p188_p2), 0.0|0.0   ;;  %vm644_vm0 = vmmov (!%p188_p2), 0   ;;  %v645_v13 = vmov (!%p188_p2), 0.0   ;;  %v249_v24 = vld [vmem:[%s764_s1] sm:$0xf] (!%p188_p2) }
   0x6   : > { %191 = sbr.rel (%p188_p2) target bundleno = 777 (0x309), region = 40  ;;  %599 = vmatprep.subr.bf16.mxu0 (!%p188_p2), %v643_v12  ;;  %588 = vmatprep.mubr.msk.f32.mxu0 (!%p188_p2), %vm644_vm0, %v645_v13  ;;  %vm251_vm1 = vcmask (!%p188_p2), 261120   ;;  %v326_v25 = vld [vmem:[%s766_s3] sm:$0xff] (!%p188_p2)  ;;  %vm334_vm2 = vcmask (!%p188_p2), 31744   ;;  %vm347_vm3 = vcmask (!%p188_p2), 1043456   ;;  %v327_v31 = vld [vmem:[%s766_s3 + $0x8] sm:$0xff] (!%p188_p2) }
   0x7   : > { %593 = vmatprep.mubr.msk.f32.mxu1 (!%p188_p2), %vm334_vm2, %v326_v25  ;;  %v250_v26 = vld [vmem:[%s765_s2] sm:$0xf] (!%p188_p2)  ;;  %v328_v32 = vld [vmem:[%s766_s3 + $0x10] sm:$0xff] (!%p188_p2)  ;;  %v329_v33 = vld [vmem:[%s766_s3 + $0x18] sm:$0xff] (!%p188_p2)  ;;  %v646_v34 = vmov (!%p188_p2), 0  }
   0x8   : > { %618 = vset.pattern.permute.xlu1 (!%p188_p2), %v646_v34  ;;  %617 = vset.pattern.permute.xlu0 (!%p188_p2), %v646_v34  ;;  %v331_v35 = vld [vmem:[%s767_s4 + $0x8] sm:$0xff] (!%p188_p2)  ;;  %v330_v36 = vld [vmem:[%s767_s4] sm:$0xff] (!%p188_p2)  ;;  %v333_v41 = vld [vmem:[%s767_s4 + $0x18] sm:$0xff] (!%p188_p2) }
   0x9   : > { %v332_v43 = vld [vmem:[%s767_s4 + $0x10] sm:$0xff] (!%p188_p2) }
   0xd   : > { %s770_s19 = smov (!%p215_p3, %s551_s19), 1 }
   0xe   : > { %s568_s20 = sshll.u32 %s770_s19, 6 }
   0xf   : > { %s219_s23 = scalar_lea.vmem %s763_s0, %s568_s20  ;;  %s224_s24 = scalar_lea.vmem %s768_s5, %s568_s20 }
  0x10   : > { %v693_v0 = vld [vmem:[%s219_s23 + $0x20] sm:$0xff]  ;;  %v695_v1 = vld [vmem:[%s219_s23 + $0x28] sm:$0xff]  ;;  %v703_v5 = vld [vmem:[%s219_s23 + $0x30] sm:$0xff] }
  0x11   : > { %v697_v2 = vld [vmem:[%s219_s23] sm:$0xff]  ;;  %v239_v3 = vadd.f32 %v695_v1, %v693_v0  ;;  %v701_v4 = vld [vmem:[%s219_s23 + $0x8] sm:$0xff]  ;;  %v705_v6 = vld [vmem:[%s219_s23 + $0x38] sm:$0xff] }
  0x12   : > { %v233_v7 = vadd.f32 %v701_v4, %v697_v2  ;;  %v709_v8 = vld [vmem:[%s219_s23 + $0x10] sm:$0xff]  ;;  %v711_v9 = vld [vmem:[%s219_s23 + $0x18] sm:$0xff]  ;;  %v242_v10 = vadd.f32 %v705_v6, %v703_v5 }
  0x13   : > { %240 = vadd.xlane.f32.xlu1 %v239_v3  ;;  %v236_v11 = vadd.f32 %v711_v9, %v709_v8 }
  0x14   : > { %234 = vadd.xlane.f32.xlu0 %v233_v7 }
  0x17   : > { %243 = vadd.xlane.f32.xlu1 %v242_v10 }
  0x18   : > { %237 = vadd.xlane.f32.xlu0 %v236_v11 }
  0xa0   : > { %v241_v14 = vpop.xlane.xlu1 %240 }
  0xa1   : > { %v235_v15 = vpop.xlane.xlu0 %234  ;;  %v247_v20 = vmul.f32 0.00390625, %v241_v14 }
  0xa2   : > { %v245_v18 = vmul.f32 0.00390625, %v235_v15 }
  0xa4   : > { %v244_v16 = vpop.xlane.xlu1 %243 }
  0xa5   : > { %v238_v17 = vpop.xlane.xlu0 %237  ;;  %v248_v21 = vmul.f32 0.00390625, %v244_v16 }
  0xa6   : > { %v246_v19 = vmul.f32 0.00390625, %v238_v17 }
  0xa7   : > { %v603_v23 = vpack.c.bf16 %v248_v21, %v247_v20 }
  0xa8   : > { %v600_v22 = vpack.c.bf16 %v246_v19, %v245_v18 }
  0xaa   : > { %601 = vmatpush3.bf16.msra.mxu0 %v600_v22 }
  0xab   : > { %602 = vmatprep.subr.bf16.mxu0 %v643_v12 }
  0xae   : > { %604 = vmatpush3.bf16.msra.mxu0 %v603_v23 }
  0xb1   : > { %589 = vmatmul.mubr.msk.f32.vlgmr.msra.gmra.mrb[0].mxu0 %vm251_vm1, %v249_v24 }
 0x184   : > { %v321_v27 = vpop.f32.mrb[0].mxu0 }
 0x185   : > { %v322_v28 = vadd.f32 %v321_v27, %v250_v26  ;;  %v590_v29 = vpop.f32.mrb[1].mxu0 }
 0x187   : > { %v325_v30 = vmax.f32 %v322_v28, 0.0 }
 0x189   : > { %591 = vmatprep.subr.msk.mxu1 %vm347_vm3, %v325_v30 }
 0x18a   : > { %592 = vmatpush3.msk.msra.mxu1 %vm347_vm3, %v325_v30 }
 0x18b   : > { %594 = vmatmul.mubr.msk.f32.vlgmr.msra.gmra.mrb[0].mxu1 %vm334_vm2, %v327_v31 }
 0x18c   : > { %596 = vmatprep.mubr.msk.f32.mxu1 %vm334_vm2, %v328_v32 }
 0x18f   : > { %597 = vmatmul.mubr.msk.f32.gmra.mrb[2].mxu1 %vm334_vm2, %v329_v33 }
 0x25e   : > { %v595_v37 = vpop.f32.mrb[0].mxu1 }
 0x25f   : > { %v423_v38 = vadd.f32 %v595_v37, %v331_v35  ;;  %v417_v39 = vpop.f32.mrb[1].mxu1 }
 0x260   : > { %v418_v40 = vadd.f32 %v417_v39, %v330_v36 }
 0x261   : > { %v437_v42 = vsub.f32 0.0, %v423_v38 }
 0x262   : > { %v436_v44 = vsub.f32 0.0, %v418_v40  ;;  %v598_v45 = vpop.f32.mrb[2].mxu1 }
 0x263   : > { %v442_v46 = vmul.f32 1.442695, %v437_v42  ;;  %v433_v47 = vadd.f32 %v598_v45, %v333_v41  ;;  %v427_v48 = vpop.f32.mrb[3].mxu1 }
 0x264   : > { %v440_v49 = vmul.f32 1.442695, %v436_v44  ;;  %v428_v50 = vadd.f32 %v427_v48, %v332_v43 }
 0x265   : > { %619 = vpow2.f32 %v442_v46  ;;  %v439_v51 = vsub.f32 0.0, %v433_v47 }
 0x266   : > { %621 = vpow2.f32 %v440_v49  ;;  %v438_v52 = vsub.f32 0.0, %v428_v50 }
 0x267   : > { %v446_v53 = vmul.f32 1.442695, %v439_v51 }
 0x268   : > { %v444_v54 = vmul.f32 1.442695, %v438_v52 }
 0x269   : > { %623 = vpow2.f32 %v446_v53 }
 0x26a   : > { %625 = vpow2.f32 %v444_v54 }
 0x26f   : > { %v620_v55 = vpop.eup %619 }
 0x270   : > { %v622_v56 = vpop.eup %621  ;;  %v449_v57 = vadd.f32 1.0, %v620_v55 }
 0x271   : > { %v448_v58 = vadd.f32 1.0, %v622_v56 }
 0x272   : > { %627 = vrcp.f32 %v449_v57 }
 0x273   : > { %v624_v59 = vpop.eup %623  ;;  %629 = vrcp.f32 %v448_v58 }
 0x274   : > { %v626_v60 = vpop.eup %625  ;;  %v451_v62 = vadd.f32 1.0, %v624_v59 }
 0x275   : > { %v450_v61 = vadd.f32 1.0, %v626_v60 }
 0x277   : > { %631 = vrcp.f32 %v450_v61 }
 0x278   : > { %633 = vrcp.f32 %v451_v62 }
 0x27c   : > { %v628_v63 = vpop.eup %627 }
 0x27d   : > { %v630_v3 = vpop.eup %629  ;;  %467 = vperm.xlu1 %618, %v628_v63  }
 0x27e   : > { %462 = vperm.xlu0 %617, %v630_v3  }
 0x281   : > { %v632_v7 = vpop.eup %631 }
 0x282   : > { %472 = vperm.xlu1 %618, %v632_v7   ;;  %v634_v10 = vpop.eup %633 }
 0x286   : > { %477 = vperm.xlu1 %618, %v634_v10  }
 0x2fc   : > { %v468_v11 = vpop.permute.xlu1 %467 }
 0x2fd   : > { %v482_v12 = vmul.f32 %v468_v11, %v709_v8  ;;  %v483_v13 = vmul.f32 %v468_v11, %v711_v9  ;;  %v463_v14 = vpop.permute.xlu0 %462 }
 0x2fe   : > { %v480_v15 = vmul.f32 %v463_v14, %v697_v2  ;;  %v481_v16 = vmul.f32 %v463_v14, %v701_v4 }
 0x2ff   : > { %490 = vst [vmem:[%s224_s24 + $0x10] sm:$0xff] %v482_v12  ;;  %491 = vst [vmem:[%s224_s24 + $0x18] sm:$0xff] %v483_v13 }
 0x300   : > { %488 = vst [vmem:[%s224_s24] sm:$0xff] %v480_v15  ;;  %489 = vst [vmem:[%s224_s24 + $0x8] sm:$0xff] %v481_v16 }
 0x301   : > { %v473_v17 = vpop.permute.xlu1 %472 }
 0x302   : > { %v484_v18 = vmul.f32 %v473_v17, %v693_v0  ;;  %v485_v19 = vmul.f32 %v473_v17, %v695_v1 }
 0x304   : > { %492 = vst [vmem:[%s224_s24 + $0x20] sm:$0xff] %v484_v18  ;;  %493 = vst [vmem:[%s224_s24 + $0x28] sm:$0xff] %v485_v19 }
 0x305   : > { %v478_v20 = vpop.permute.xlu1 %477 }
 0x306   : > { %v486_v8 = vmul.f32 %v478_v20, %v703_v5  ;;  %v487_v9 = vmul.f32 %v478_v20, %v705_v6 }
 0x308   : > { %494 = vst [vmem:[%s224_s24 + $0x30] sm:$0xff] %v486_v8  ;;  %495 = vst [vmem:[%s224_s24 + $0x38] sm:$0xff] %v487_v9 }
 0x309 PF: > { %s15_s18 = sadd.s32 1, %s641_s18  }
 0x30a   : > { %p12_p4 = scmp.ge.s32.totalorder %s15_s18, 4  }
 0x30c   :  { %14 = sbr.rel (!%p12_p4) target bundleno = 1 (0x1), region = 70 }

</bundles_post_ra>
